<compile_context>
chip_gen: v7x
topology: tpu7x:2x2x1
jax: 0.10.0
libtpu: 0.0.40
codegen_flags: <defaults>
</compile_context>

<pallas_src>
import jax
import jax.numpy as jnp
from jax.experimental import pallas as pl
from jax.experimental.pallas import tpu as pltpu


def _dma_identity_kernel(x_hbm, o_hbm, sem):
    # One whole-array HBM -> HBM DMA; no VMEM bounce, no tiling.
    cp = pltpu.make_async_copy(x_hbm, o_hbm, sem)
    cp.start()
    cp.wait()


def _pallas_identity_copy(x: jax.Array) -> jax.Array:
    return pl.pallas_call(
        _dma_identity_kernel,
        out_shape=jax.ShapeDtypeStruct(x.shape, x.dtype),
        in_specs=[pl.BlockSpec(memory_space=pl.ANY)],
        out_specs=pl.BlockSpec(memory_space=pl.ANY),
        scratch_shapes=[pltpu.SemaphoreType.DMA(())],
    )(x)


class BaseRepresentation:
    """JAX/Pallas port of the abstract base representation.

    Holds only the representation config. No parameters are created
    (matching the PyTorch __init__, which registers nothing).
    """

    def __init__(self, representation_cfg):
        self.representation_cfg = representation_cfg

    def forward(self, *args, **kwargs):
        # Faithful to the reference: the base class does not implement forward.
        raise NotImplementedError('not implemented!')

    # --- synthetic pass-through used to exercise the Pallas kernel path ----
    def identity_passthrough(self, x: jax.Array) -> jax.Array:
        """Identity 'representation' computed via a single HBM->HBM Pallas DMA.

        Accepts a tensor of any rank (incl. 0-D / 1-D) and any dtype; returns
        a tensor of identical shape/dtype/values.
        """
        if x.size == 0:
            return x
        if x.ndim == 0:
            # Trivial scalar: give the DMA a rank-1 view, restore afterwards.
            return _pallas_identity_copy(x.reshape(1)).reshape(())
        return _pallas_identity_copy(x)

    @classmethod
    def load_pretrained_model(cls, cfg, pretrained_model_path):
        # Matches the reference: a no-op hook for subclasses.
        pass

    def independent_lr_parameters(self):
        # The base class has no parameters; mirror the cfg-gated behavior.
        if 'LEARNING_RATE' in self.representation_cfg:
            return [{'params': [], 'lr': self.representation_cfg['LEARNING_RATE']}]
        return []


if __name__ == "__main__":
    cfg = {'LEARNING_RATE': 1e-4}
    rep = BaseRepresentation(cfg)

    # Verify the abstract forward() behaves like the reference.
    try:
        rep.forward()
        raise AssertionError("forward() should have raised NotImplementedError")
    except NotImplementedError:
        pass

    key = jax.random.PRNGKey(0)

    # Small NCHW input, f32.
    x = jax.random.normal(key, (2, 4, 16, 16), dtype=jnp.float32)  # [B, C, H, W]
    y = jax.block_until_ready(rep.identity_passthrough(x))
    assert y.shape == x.shape and y.dtype == x.dtype
    assert bool(jnp.allclose(y, x))

    # Non-aligned shape + bf16: the whole-array DMA needs no padding/slicing.
    x2 = jax.random.normal(jax.random.PRNGKey(1), (3, 5, 7), dtype=jnp.bfloat16)
    y2 = jax.block_until_ready(rep.identity_passthrough(x2))
    assert y2.shape == x2.shape and y2.dtype == x2.dtype
    assert bool(jnp.all(y2 == x2))

    # 1-D integer input to exercise a different rank/dtype through the DMA.
    x3 = jnp.arange(37, dtype=jnp.int32)
    y3 = jax.block_until_ready(rep.identity_passthrough(x3))
    assert y3.shape == x3.shape and y3.dtype == x3.dtype
    assert bool(jnp.all(y3 == x3))

    # independent_lr_parameters returns the LR group (empty params) per the cfg.
    assert rep.independent_lr_parameters()[0]['lr'] == 1e-4

    print("KERNEL_OK")
</pallas_src>

<mosaic_0001>
module attributes {stable_mosaic.version = 11 : i64} {
  func.func @_dma_identity_kernel(%arg0: memref<2x4x16x16xf32, #tpu.memory_space<any>>, %arg1: memref<2x4x16x16xf32, #tpu.memory_space<any>>, %arg2: memref<!tpu.dma_semaphore, #tpu.memory_space<semaphore_mem>>) attributes {dimension_semantics = [], scalar_prefetch = 0 : i64, scratch_operands = 1 : i64, tpu.core_type = #tpu.core_type<tc>} {
    tpu.enqueue_dma source(%arg0 : memref<2x4x16x16xf32, #tpu.memory_space<any>>) target(%arg1 : memref<2x4x16x16xf32, #tpu.memory_space<any>>) target_semaphore(%arg2 : memref<!tpu.dma_semaphore, #tpu.memory_space<semaphore_mem>>)
    tpu.wait_dma2 semaphore(%arg2 : memref<!tpu.dma_semaphore, #tpu.memory_space<semaphore_mem>>) src(%arg0 : memref<2x4x16x16xf32, #tpu.memory_space<any>>) dst(%arg1 : memref<2x4x16x16xf32, #tpu.memory_space<any>>)
    return
  }
}

</mosaic_0001>

<bundles_post_ra>
// kernel: tpu_custom_call.1
= control target key start
LH: loop header
LB: loop body
LE: loop exit
PB: predicated region body
PF: predicated region fallthrough
CT: control target
= control target key end

     0   :  { %s36_s6 = smov [#allocation2]   ;;  %s37_s7 = smov [#allocation3]   ;;  %s55_s0 = inlined_call_operand.hbm [shape: f32[2,4,16,16], index: 0, kind: input, shape index: {}]   ;;  %s56_s1 = inlined_call_operand.hbm [shape: f32[2,4,16,16], index: 1, kind: output, shape index: {}]  }
   0x1   :  { %s38_s8 = smov 0  }
   0x2   :  { %18 = dma.general %s55_s0, 2048, %s56_s1, %s36_s6, %s37_s7, [#allocation4], %s38_s8, 0  }
   0x3   :  { %34 = dma.done.wait [#allocation2], 2048 }
   0x4   :  { %35 = vsyncadd [#allocation2], 4294965248 }
   0x5   :  { %24 = vsyncmov [#allocation2] }
   0x8   :  { %s25_s13 = vpop.sfrf %24 }
   0x9   :  { %p30_p0 = scmp.ne.s32.totalorder %s25_s13, 0 }
   0xb   :  { %29 = shalt.err (%p30_p0)  }

</bundles_post_ra>
